<compile_context>
chip_gen: v5e
topology: v5e:2x2
jax: 0.10.0
libtpu: 0.0.40
codegen_flags: <defaults>
</compile_context>

<pallas_src>
import functools
import math

import jax
import jax.numpy as jnp
from jax.experimental import pallas as pl
from jax.experimental.pallas import tpu as pltpu


_COMPILER_PARAMS = pltpu.CompilerParams(
    # Row-tile axis is embarrassingly parallel -> shards across the 2 TensorCores on v7x.
    dimension_semantics=("parallel",),
    # Explicit scoped-VMEM budget: safe on v7x (64 MiB physical), generous on v5e/v6e.
    vmem_limit_bytes=48 * 1024 * 1024,
)


def _round_up(x, m):
    return ((x + m - 1) // m) * m


# ---------------------------------------------------------------------------
# Fused conv-as-matmul + folded BatchNorm (eval) + activation kernel.
# ---------------------------------------------------------------------------
def _matmul_bn_act_kernel(x_ref, w_ref, scale_ref, shift_ref, o_ref, *, act):
    # x_ref: (TM, K) bf16 im2col patches, w_ref: (K, N) bf16, scale/shift: (1, N) f32.
    acc = jnp.dot(x_ref[...], w_ref[...], preferred_element_type=jnp.float32)
    y = acc * scale_ref[...].astype(jnp.float32) + shift_ref[...].astype(jnp.float32)
    if act == "relu":
        y = jnp.maximum(y, 0.0)
    elif act == "sigmoid":
        y = 1.0 / (1.0 + jnp.exp(-y))
    elif act == "tanh":
        y = jnp.tanh(y)
    o_ref[...] = y.astype(o_ref.dtype)


def matmul_bn_act(x2d, w2d, scale, shift, *, act="relu", tm=256):
    """(M, K) @ (K, N) * scale + shift -> activation. Row-tiled, weights VMEM-resident."""
    M, K = x2d.shape
    N = w2d.shape[1]
    TM = tm if M >= tm else _round_up(M, 8)   # sublane-aligned row tile
    Mp = _round_up(M, TM)
    if Mp != M:
        x2d = jnp.pad(x2d, ((0, Mp - M), (0, 0)))
    out = pl.pallas_call(
        functools.partial(_matmul_bn_act_kernel, act=act),
        out_shape=jax.ShapeDtypeStruct((Mp, N), jnp.float32),
        grid_spec=pltpu.PrefetchScalarGridSpec(
            num_scalar_prefetch=0,
            grid=(Mp // TM,),
            in_specs=[
                pl.BlockSpec((TM, K), lambda i: (i, 0)),  # streamed activation rows
                pl.BlockSpec((K, N), lambda i: (0, 0)),   # weight: constant block -> resident
                pl.BlockSpec((1, N), lambda i: (0, 0)),   # BN scale: resident
                pl.BlockSpec((1, N), lambda i: (0, 0)),   # BN shift: resident
            ],
            out_specs=pl.BlockSpec((TM, N), lambda i: (i, 0)),
        ),
        compiler_params=_COMPILER_PARAMS,
    )(x2d, w2d, scale, shift)
    return out[:M]


# ---------------------------------------------------------------------------
# ConvGRU gating: two small elementwise Pallas kernels (lane-dense, C = 512).
# ---------------------------------------------------------------------------
def _gru_gates_kernel(az_ref, bz_ref, ar_ref, br_ref, h0_ref, z_ref, rh_ref):
    z = 1.0 / (1.0 + jnp.exp(-(az_ref[...] + bz_ref[...])))   # z_t
    r = 1.0 / (1.0 + jnp.exp(-(ar_ref[...] + br_ref[...])))   # r_t
    z_ref[...] = z
    rh_ref[...] = r * h0_ref[...]                             # r_t * h_0


def _gru_combine_kernel(c_ref, d_ref, z_ref, h0_ref, h1_ref):
    h_hat = jnp.tanh(c_ref[...] + d_ref[...])                 # h_1_hat
    z = z_ref[...]
    h1_ref[...] = (1.0 - z) * h0_ref[...] + z * h_hat         # h_1


def _elementwise_call(kernel, inputs, n_out, *, tm=256):
    M, C = inputs[0].shape
    TM = tm if M >= tm else _round_up(M, 8)
    Mp = _round_up(M, TM)
    if Mp != M:
        inputs = [jnp.pad(a, ((0, Mp - M), (0, 0))) for a in inputs]
    spec = pl.BlockSpec((TM, C), lambda i: (i, 0))
    if n_out == 1:
        out_shape = jax.ShapeDtypeStruct((Mp, C), jnp.float32)
        out_specs = spec
    else:
        out_shape = tuple(jax.ShapeDtypeStruct((Mp, C), jnp.float32) for _ in range(n_out))
        out_specs = tuple(spec for _ in range(n_out))
    outs = pl.pallas_call(
        kernel,
        out_shape=out_shape,
        grid_spec=pltpu.PrefetchScalarGridSpec(
            num_scalar_prefetch=0,
            grid=(Mp // TM,),
            in_specs=[spec] * len(inputs),
            out_specs=out_specs,
        ),
        compiler_params=_COMPILER_PARAMS,
    )(*inputs)
    if n_out == 1:
        outs = (outs,)
    return tuple(o[:M] for o in outs)


# ---------------------------------------------------------------------------
# Module building blocks (NHWC activations).
# ---------------------------------------------------------------------------
def _im2col(x, k, pad):
    """(B,H,W,C) -> (B*H*W, k*k*C) stride-1 'same' patches, (ky, kx, c) minor order."""
    B, H, W, C = x.shape
    if pad:
        x = jnp.pad(x, ((0, 0), (pad, pad), (pad, pad), (0, 0)))
    cols = [x[:, dy:dy + H, dx:dx + W, :] for dy in range(k) for dx in range(k)]
    patches = cols[0] if len(cols) == 1 else jnp.concatenate(cols, axis=-1)
    return patches.reshape(B * H * W, k * k * C)


def conv_bn_relu(x, p):
    """Conv2dReLU (eval mode): Conv2d(k, pad, bias=False) + folded BatchNorm + ReLU."""
    k = p["k"]
    pad = (k - 1) // 2
    B, H, W, Cin = x.shape
    Cout = p["w"].shape[-1]
    patches = _im2col(x, k, pad).astype(jnp.bfloat16)               # bf16 MXU operand
    w2d = p["w"].reshape(k * k * Cin, Cout).astype(jnp.bfloat16)    # bf16 MXU operand
    y = matmul_bn_act(patches, w2d, p["scale"].reshape(1, Cout),
                      p["shift"].reshape(1, Cout), act="relu")
    return y.reshape(B, H, W, Cout)


def convgru_cell(p, x, h0):
    """ConvGRU_Cell.forward (every conv is a Conv2dReLU, per the PyTorch module)."""
    az = conv_bn_relu(x, p["conv_x_z"])
    bz = conv_bn_relu(h0, p["conv_h_z"])
    ar = conv_bn_relu(x, p["conv_x_r"])
    br = conv_bn_relu(h0, p["conv_h_r"])
    c = conv_bn_relu(x, p["conv"])
    B, H, W, C = az.shape
    flat = lambda t: t.reshape(B * H * W, C)
    z2d, rh2d = _elementwise_call(
        _gru_gates_kernel, [flat(az), flat(bz), flat(ar), flat(br), flat(h0)], 2)
    d = conv_bn_relu(rh2d.reshape(B, H, W, C), p["conv_h"])
    (h1_2d,) = _elementwise_call(
        _gru_combine_kernel, [flat(c), flat(d), z2d, flat(h0)], 1)
    return conv_bn_relu(h1_2d.reshape(B, H, W, C), p["conv_out"])


def _interp_matrix(n_in, n_out):
    """Dense 1-D bilinear interpolation matrix, align_corners=True (UpsamplingBilinear2d)."""
    out_i = jnp.arange(n_out, dtype=jnp.float32)
    if n_out == 1:
        src = jnp.zeros((1,), jnp.float32)
    else:
        src = out_i * (n_in - 1) / (n_out - 1)
    lo = jnp.clip(jnp.floor(src), 0, max(n_in - 2, 0)).astype(jnp.int32)
    hi = jnp.minimum(lo + 1, n_in - 1)
    w_hi = src - lo.astype(jnp.float32)
    w_lo = 1.0 - w_hi
    return (w_lo[:, None] * jax.nn.one_hot(lo, n_in)
            + w_hi[:, None] * jax.nn.one_hot(hi, n_in))


def upsample_bilinear_x2(x):
    # TODO(synk): align_corners=True bilinear stays as two tiny dense interpolation einsums in
    # plain JAX; it could reuse the Pallas matmul kernel but contributes negligible FLOPs.
    B, H, W, C = x.shape
    ah = _interp_matrix(H, 2 * H)
    aw = _interp_matrix(W, 2 * W)
    x = jnp.einsum("oh,bhwc->bowc", ah, x)
    x = jnp.einsum("ow,bhwc->bhoc", aw, x)
    return x


def decoder_block(p, x, skip=None):
    """DecoderBlock.forward with skip=None (features=None / n_skip=0 in this config)."""
    x = upsample_bilinear_x2(x)
    # TODO(synk): skip branch (ConvGRU on the skip + channel concat) is not exercised here.
    x = conv_bn_relu(x, p["conv1"])
    x = conv_bn_relu(x, p["conv2"])
    return x


def decoder_cup_forward(params, hidden_states, pcca_feat, features=None):
    """DecoderCup.forward (with_pcca=True, with_gru=True), NHWC internally, NCHW out."""
    B, n_patch, hidden = hidden_states.shape
    h = w = int(math.sqrt(n_patch))
    # torch: permute(0,2,1).view(B, hidden, h, w)  ==  NHWC reshape (B, h, w, hidden).
    x = hidden_states.reshape(B, h, w, hidden)
    x = conv_bn_relu(x, params["conv_more"])
    x = convgru_cell(params["convgru"], x, pcca_feat)
    # TODO(synk): with_gru=False (cat_conv) and with_pcca=False variants are not implemented.
    for bp in params["blocks"]:
        x = decoder_block(bp, x, skip=None)
    return jnp.transpose(x, (0, 3, 1, 2))   # back to NCHW like the PyTorch module


# ---------------------------------------------------------------------------
# Pure-JAX reference (no Pallas) used only for the numerical check in __main__.
# ---------------------------------------------------------------------------
def _conv_bn_relu_ref(x, p):
    k = p["k"]
    pad = (k - 1) // 2
    y = jax.lax.conv_general_dilated(
        x.astype(jnp.bfloat16), p["w"].astype(jnp.bfloat16),
        window_strides=(1, 1), padding=[(pad, pad), (pad, pad)],
        dimension_numbers=("NHWC", "HWIO", "NHWC"),
        preferred_element_type=jnp.float32)
    return jnp.maximum(y * p["scale"] + p["shift"], 0.0)


def _convgru_cell_ref(p, x, h0):
    sig = lambda v: 1.0 / (1.0 + jnp.exp(-v))
    z = sig(_conv_bn_relu_ref(x, p["conv_x_z"]) + _conv_bn_relu_ref(h0, p["conv_h_z"]))
    r = sig(_conv_bn_relu_ref(x, p["conv_x_r"]) + _conv_bn_relu_ref(h0, p["conv_h_r"]))
    h_hat = jnp.tanh(_conv_bn_relu_ref(x, p["conv"]) + _conv_bn_relu_ref(r * h0, p["conv_h"]))
    h1 = (1.0 - z) * h0 + z * h_hat
    return _conv_bn_relu_ref(h1, p["conv_out"])


def _decoder_cup_forward_ref(params, hidden_states, pcca_feat):
    B, n_patch, hidden = hidden_states.shape
    h = w = int(math.sqrt(n_patch))
    x = hidden_states.reshape(B, h, w, hidden)
    x = _conv_bn_relu_ref(x, params["conv_more"])
    x = _convgru_cell_ref(params["convgru"], x, pcca_feat)
    for bp in params["blocks"]:
        x = upsample_bilinear_x2(x)
        x = _conv_bn_relu_ref(x, bp["conv1"])
        x = _conv_bn_relu_ref(x, bp["conv2"])
    return jnp.transpose(x, (0, 3, 1, 2))


# ---------------------------------------------------------------------------
# Parameters (He-init conv weights, eval-mode BatchNorm folded to scale/shift).
# ---------------------------------------------------------------------------
def _make_conv_bn(key, cin, cout, k):
    kw, kg, kb, km, kv = jax.random.split(key, 5)
    w = jax.random.normal(kw, (k, k, cin, cout), jnp.float32) * math.sqrt(2.0 / (k * k * cin))
    gamma = 1.0 + 0.1 * jax.random.normal(kg, (cout,), jnp.float32)
    beta = 0.1 * jax.random.normal(kb, (cout,), jnp.float32)
    mean = 0.1 * jax.random.normal(km, (cout,), jnp.float32)
    var = jax.random.uniform(kv, (cout,), jnp.float32, minval=0.5, maxval=1.5)
    scale = gamma / jnp.sqrt(var + 1e-5)
    return {"k": k, "w": w, "scale": scale, "shift": beta - mean * scale}


def make_decoder_cup_params(key, hidden_size, head_channels, decoder_channels):
    k_more, k_gru, k_blocks = jax.random.split(key, 3)
    params = {"conv_more": _make_conv_bn(k_more, hidden_size, head_channels, 3)}
    gru_names = ("conv_x_z", "conv_h_z", "conv_x_r", "conv_h_r", "conv", "conv_h", "conv_out")
    gks = jax.random.split(k_gru, len(gru_names))
    params["convgru"] = {name: _make_conv_bn(gks[i], head_channels, head_channels, 3)
                         for i, name in enumerate(gru_names)}
    in_channels = [head_channels] + list(decoder_channels[:-1])
    bks = jax.random.split(k_blocks, len(decoder_channels))
    params["blocks"] = []
    for i, (cin, cout) in enumerate(zip(in_channels, decoder_channels)):
        b1, b2 = jax.random.split(bks[i], 2)
        params["blocks"].append({"conv1": _make_conv_bn(b1, cin, cout, 3),
                                 "conv2": _make_conv_bn(b2, cout, cout, 3)})
    return params


if __name__ == "__main__":
    # Small but module-consistent config: hidden_size=32, 4x4 patch grid,
    # head_channels=512 (hardcoded in DecoderCup), 4 decoder blocks, n_skip=0 / features=None.
    B, n_patch, hidden_size = 2, 16, 32
    head_channels = 512
    decoder_channels = (64, 32, 16, 16)
    h = w = int(math.sqrt(n_patch))

    key = jax.random.PRNGKey(0)
    k_params, k_hidden, k_pcca = jax.random.split(key, 3)
    params = make_decoder_cup_params(k_params, hidden_size, head_channels, decoder_channels)
    hidden_states = jax.random.normal(k_hidden, (B, n_patch, hidden_size), jnp.float32)
    pcca_feat = jax.random.normal(k_pcca, (B, h, w, head_channels), jnp.float32)

    out = decoder_cup_forward(params, hidden_states, pcca_feat)
    out = jax.block_until_ready(out)
    assert out.shape == (B, decoder_channels[-1], h * 16, w * 16), out.shape

    ref = jax.block_until_ready(_decoder_cup_forward_ref(params, hidden_states, pcca_feat))
    max_err = float(jnp.max(jnp.abs(out - ref)))
    assert jnp.allclose(out, ref, atol=3e-2, rtol=3e-2), f"max abs err = {max_err}"

    print("KERNEL_OK")
</pallas_src>

<mosaic_0001>
module attributes {stable_mosaic.version = 11 : i64} {
  func.func @_matmul_bn_act_kernel(%arg0: i32, %arg1: memref<32x288xbf16, #tpu.memory_space<vmem>>, %arg2: memref<288x512xbf16, #tpu.memory_space<vmem>>, %arg3: memref<1x512xf32, #tpu.memory_space<vmem>>, %arg4: memref<1x512xf32, #tpu.memory_space<vmem>>, %arg5: memref<32x512xf32, #tpu.memory_space<vmem>>) attributes {dimension_semantics = [#tpu.dimension_semantics<parallel>], iteration_bounds = array<i64: 1>, scalar_prefetch = 0 : i64, scratch_operands = 0 : i64, tpu.core_type = #tpu.core_type<tc>, window_params = [{transform_indices = @transform_0, window_bounds = array<i64: 32, 288>}, {pipeline_mode = #tpu.pipeline_mode<synchronous>, transform_indices = @transform_1, window_bounds = array<i64: 288, 512>}, {pipeline_mode = #tpu.pipeline_mode<synchronous>, transform_indices = @transform_2, window_bounds = array<i64: 1, 512>}, {pipeline_mode = #tpu.pipeline_mode<synchronous>, transform_indices = @transform_3, window_bounds = array<i64: 1, 512>}, {transform_indices = @transform_4, window_bounds = array<i64: 32, 512>}]} {
    %c0 = arith.constant 0 : index
    %c0_0 = arith.constant 0 : index
    %0 = vector.load %arg1[%c0, %c0_0] : memref<32x288xbf16, #tpu.memory_space<vmem>>, vector<32x288xbf16>
    %c0_1 = arith.constant 0 : index
    %c0_2 = arith.constant 0 : index
    %1 = vector.load %arg2[%c0_1, %c0_2] : memref<288x512xbf16, #tpu.memory_space<vmem>>, vector<288x512xbf16>
    %cst = arith.constant dense<0.000000e+00> : vector<32x512xf32>
    %2 = tpu.matmul %0, %1, %cst {dimension_numbers = #tpu.dot_dimension_numbers<[1], [0], [0], [1], [0, 0, 1, 1], [], []>} : vector<32x288xbf16>, vector<288x512xbf16>, vector<32x512xf32> -> vector<32x512xf32>
    %c0_3 = arith.constant 0 : index
    %c0_4 = arith.constant 0 : index
    %3 = vector.load %arg3[%c0_3, %c0_4] : memref<1x512xf32, #tpu.memory_space<vmem>>, vector<1x512xf32>
    %4 = vector.broadcast %3 : vector<1x512xf32> to vector<32x512xf32>
    %5 = arith.mulf %2, %4 : vector<32x512xf32>
    %c0_5 = arith.constant 0 : index
    %c0_6 = arith.constant 0 : index
    %6 = vector.load %arg4[%c0_5, %c0_6] : memref<1x512xf32, #tpu.memory_space<vmem>>, vector<1x512xf32>
    %7 = vector.broadcast %6 : vector<1x512xf32> to vector<32x512xf32>
    %8 = arith.addf %5, %7 : vector<32x512xf32>
    %cst_7 = arith.constant 0.000000e+00 : f32
    %9 = vector.broadcast %cst_7 : f32 to vector<32x512xf32>
    %10 = arith.maximumf %8, %9 : vector<32x512xf32>
    %c0_8 = arith.constant 0 : index
    %c0_9 = arith.constant 0 : index
    %11 = vector.load %arg5[%c0_8, %c0_9] : memref<32x512xf32, #tpu.memory_space<vmem>>, vector<32x512xf32>
    tpu.vector_store %arg5[%c0_8, %c0_9], %10 {strides = array<i32>} : memref<32x512xf32, #tpu.memory_space<vmem>>, vector<32x512xf32>,
    return
  }
  func.func @transform_0(%arg0: i32) -> (i32, i32) {
    %c0_i32 = arith.constant 0 : i32
    %c0_i32_0 = arith.constant 0 : i32
    return %arg0, %c0_i32 : i32, i32
  }
  func.func @transform_1(%arg0: i32) -> (i32, i32) {
    %c0_i32 = arith.constant 0 : i32
    %c0_i32_0 = arith.constant 0 : i32
    %c0_i32_1 = arith.constant 0 : i32
    return %c0_i32, %c0_i32_0 : i32, i32
  }
  func.func @transform_2(%arg0: i32) -> (i32, i32) {
    %c0_i32 = arith.constant 0 : i32
    %c0_i32_0 = arith.constant 0 : i32
    %c0_i32_1 = arith.constant 0 : i32
    return %c0_i32, %c0_i32_0 : i32, i32
  }
  func.func @transform_3(%arg0: i32) -> (i32, i32) {
    %c0_i32 = arith.constant 0 : i32
    %c0_i32_0 = arith.constant 0 : i32
    %c0_i32_1 = arith.constant 0 : i32
    return %c0_i32, %c0_i32_0 : i32, i32
  }
  func.func @transform_4(%arg0: i32) -> (i32, i32) {
    %c0_i32 = arith.constant 0 : i32
    %c0_i32_0 = arith.constant 0 : i32
    return %arg0, %c0_i32 : i32, i32
  }
}

</mosaic_0001>

<bundles_post_ra>
// kernel: tpu_custom_call.1
= control target key start
LH: loop header
LB: loop body
LE: loop exit
PB: predicated region body
PF: predicated region fallthrough
CT: control target
= control target key end

     0   :  { %9 = vsyncpa [#allocation3], 0  ;;  %s1540_s0 = inlined_call_operand.hbm [shape: bf16[32,288], index: 0, kind: input, shape index: {}]   ;;  %s1541_s1 = inlined_call_operand.hbm [shape: bf16[288,512], index: 1, kind: input, shape index: {}]   ;;  %s1542_s2 = inlined_call_operand.hbm [shape: f32[1,512], index: 2, kind: input, shape index: {}]   ;;  %s1543_s3 = inlined_call_operand.hbm [shape: f32[1,512], index: 3, kind: input, shape index: {}]   ;;  %s1544_s4 = inlined_call_operand.hbm [shape: f32[32,512], index: 4, kind: output, shape index: {}]  }
   0x1   :  { %10 = vsyncpa [#allocation6], 0 }
   0x2   :  { %11 = vsyncpa [#allocation9], 0  ;;  %s30_s17 = sshll.u32 %s1541_s1, 4  ;;  %s31_s17 = int_to_ptr.hbm [resolvable:$true] %s30_s17 }
   0x3   :  { %12 = vsyncpa [#allocation4], 0  ;;  %s1433_s18 = smov [#allocation5]   ;;  %s17_s22 = sshll.u32 %s1540_s0, 4  ;;  %s18_s22 = int_to_ptr.hbm [resolvable:$true] %s17_s22 }
   0x4   :  { %s32_s19 = sshll.u32 %s1433_s18, 4  ;;  %s1434_s23 = smov 256   ;;  %s33_s19 = int_to_ptr.vmem [resolvable:$true] %s32_s19 }
   0x5   :  { %s1435_s24 = smov 16   ;;  %s1436_s25 = smov [#allocation2]  }
   0x6   :  { %38 = dma.hbm_to_vmem [thread:$0]  %s31_s17, 9216, %s33_s19, [#allocation6], %s1434_s23, %s1434_s23, %s1435_s24  }
   0x7   :  { %s19_s26 = sshll.u32 %s1436_s25, 4  ;;  %s1437_s27 = smov 192   ;;  %s20_s26 = int_to_ptr.vmem [resolvable:$true] %s19_s26 }
   0x8   :  { %s1438_s28 = smov 12   ;;  %s44_s30 = sshll.u32 %s1542_s2, 4  ;;  %s45_s30 = int_to_ptr.hbm [resolvable:$true] %s44_s30 }
   0x9   :  { %25 = dma.hbm_to_vmem [thread:$0]  %s18_s22, 768, %s20_s26, [#allocation3], %s1437_s27, %s1437_s27, %s1438_s28  }
   0xa   :  { %s1439_s5 = smov [#allocation7]   ;;  %s55_s8 = sshll.u32 %s1543_s3, 4  ;;  %s56_s8 = int_to_ptr.hbm [resolvable:$true] %s55_s8 }
   0xb   :  { %s46_s6 = sshll.u32 %s1439_s5, 4  ;;  %s1440_s9 = smov [#allocation8]   ;;  %s47_s6 = int_to_ptr.vmem [resolvable:$true] %s46_s6 }
   0xc   :  { %49 = dma.hbm_to_vmem [thread:$0]  %s45_s30, 64, %s47_s6, [#allocation6]  }
   0xd   :  { %s57_s10 = sshll.u32 %s1440_s9, 4  ;;  %s58_s10 = int_to_ptr.vmem [resolvable:$true] %s57_s10 }
   0xe   :  { %60 = dma.hbm_to_vmem [thread:$0]  %s56_s8, 64, %s58_s10, [#allocation9]  }
   0xf   :  { %1425 = dma.done.wait [#allocation3], 768  }
  0x10   :  { %1426 = vsyncadd [#allocation3], 4294966528 }
  0x11   :  { %1427 = dma.done.wait [#allocation6], 9280  }
  0x12   :  { %1428 = vsyncadd [#allocation6], 4294958016 }
  0x13   :  { %1429 = dma.done.wait [#allocation9], 64  }
  0x14   :  { %1430 = vsyncadd [#allocation9], 4294967232  ;;  %v1026_v0 = vld [vmem:[#allocation5 + $0xe0] sm:$0xf]  ;;  %v1244_v1 = vld [vmem:[#allocation5 + $0xec] sm:$0xf0] }
  0x15   :  { %v1154_v2 = vld [vmem:[#allocation5 + $0x1e0] sm:$0xf]  ;;  %vm548_vm0 = vcmask 261120   ;;  %v1027_v3 = vor.u32 %v1244_v1, %v1026_v0  ;;  %v1276_v4 = vld [vmem:[#allocation5 + $0x1ec] sm:$0xf0]  ;;  %s1441_s2 = smov [#allocation10]  }
  0x16   :  { %v1186_v5 = vld [vmem:[#allocation5 + $0x220] sm:$0xf]  ;;  %v1284_v6 = vld [vmem:[#allocation5 + $0x22c] sm:$0xf0]  ;;  %v1155_v7 = vor.u32 %v1276_v4, %v1154_v2  ;;  %v1242_v9 = vld [vmem:[#allocation5 + $0xe4] sm:$0xf] }
  0x17   :  { %v1187_v8 = vor.u32 %v1284_v6, %v1186_v5  ;;  %v1028_v10 = vld [vmem:[#allocation5 + $0xf0] sm:$0xf0]  ;;  %v1010_v11 = vld [vmem:[#allocation5 + $0xc0] sm:$0xf]  ;;  %555 = vmatpush.bf16.msra.mxu0 %v1027_v3  ;;  %v1240_v13 = vld [vmem:[#allocation5 + $0xcc] sm:$0xf0] }
  0x18   :  { %v1031_v12 = vor.u32 %v1242_v9, %v1028_v10  ;;  %v1138_v14 = vld [vmem:[#allocation5 + $0x1c0] sm:$0xf]  ;;  %v1272_v15 = vld [vmem:[#allocation5 + $0x1cc] sm:$0xf0]  ;;  %574 = vmatpush.bf16.msra.mxu1 %v1155_v7  ;;  %v1011_v16 = vor.u32 %v1240_v13, %v1010_v11  ;;  %v1238_v20 = vld [vmem:[#allocation5 + $0xc4] sm:$0xf] }
  0x19   :  { %599 = vmatpush.bf16.msra.mxu2 %v1187_v8  ;;  %v1139_v17 = vor.u32 %v1272_v15, %v1138_v14  ;;  %v1170_v18 = vld [vmem:[#allocation5 + $0x200] sm:$0xf]  ;;  %v1280_v19 = vld [vmem:[#allocation5 + $0x20c] sm:$0xf0]  ;;  %v1012_v22 = vld [vmem:[#allocation5 + $0xd0] sm:$0xf0] }
  0x1a   :  { %612 = vmatpush.bf16.msra.mxu3 %v1031_v12  ;;  %v1171_v21 = vor.u32 %v1280_v19, %v1170_v18  ;;  %v898_v23 = vld [vmem:[#allocation2 + $0x8] sm:$0xf]  ;;  %v1210_v24 = vld [vmem:[#allocation2 + $0x10] sm:$0xf0]  ;;  %v1015_v25 = vor.u32 %v1238_v20, %v1012_v22  ;;  %v994_v26 = vld [vmem:[#allocation5 + $0xa0] sm:$0xf] }
  0x1b   :  { %v1236_v27 = vld [vmem:[#allocation5 + $0xac] sm:$0xf0]  ;;  %v1122_v28 = vld [vmem:[#allocation5 + $0x1a0] sm:$0xf]  ;;  %556 = vmatpush.bf16.msra.mxu0 %v1011_v16  ;;  %v1481_v29 = vor.u32 %v1210_v24, %v898_v23  ;;  %v1234_v32 = vld [vmem:[#allocation5 + $0xa4] sm:$0xf] }
  0x1c   :  { %v995_v30 = vor.u32 %v1236_v27, %v994_v26  ;;  %v1268_v31 = vld [vmem:[#allocation5 + $0x1ac] sm:$0xf0]  ;;  %v996_v33 = vld [vmem:[#allocation5 + $0xb0] sm:$0xf0]  ;;  %575 = vmatpush.bf16.msra.mxu1 %v1139_v17  ;;  %v1274_v35 = vld [vmem:[#allocation5 + $0x1e4] sm:$0xf] }
  0x1d   :  { %600 = vmatpush.bf16.msra.mxu2 %v1171_v21  ;;  %v1123_v34 = vor.u32 %v1268_v31, %v1122_v28  ;;  %v1156_v36 = vld [vmem:[#allocation5 + $0x1f0] sm:$0xf0]  ;;  %v978_v37 = vld [vmem:[#allocation5 + $0x80] sm:$0xf]  ;;  %v999_v38 = vor.u32 %v1234_v32, %v996_v33  ;;  %v1232_v40 = vld [vmem:[#allocation5 + $0x8c] sm:$0xf0] }
  0x1e   :  { %613 = vmatpush.bf16.msra.mxu3 %v1015_v25  ;;  %v1159_v39 = vor.u32 %v1274_v35, %v1156_v36  ;;  %v1106_v41 = vld [vmem:[#allocation5 + $0x180] sm:$0xf]  ;;  %v1264_v42 = vld [vmem:[#allocation5 + $0x18c] sm:$0xf0]  ;;  %v1230_v43 = vld [vmem:[#allocation5 + $0x84] sm:$0xf]  ;;  %v979_v46 = vor.u32 %v1232_v40, %v978_v37 }
  0x1f   :  { %v980_v44 = vld [vmem:[#allocation5 + $0x90] sm:$0xf0]  ;;  %v1270_v45 = vld [vmem:[#allocation5 + $0x1c4] sm:$0xf]  ;;  %557 = vmatpush.bf16.msra.mxu0 %v995_v30  ;;  %v1107_v48 = vor.u32 %v1264_v42, %v1106_v41  ;;  %v962_v50 = vld [vmem:[#allocation5 + $0x60] sm:$0xf] }
  0x20   :  { %1200 = vmatmul.msk.bf16.vlgmr.msra.gmra.mxu2 %vm548_vm0, %v1481_v29  ;;  %v1140_v47 = vld [vmem:[#allocation5 + $0x1d0] sm:$0xf0]  ;;  %576 = vmatpush.bf16.msra.mxu1 %v1123_v34  ;;  %v1228_v51 = vld [vmem:[#allocation5 + $0x6c] sm:$0xf0]  ;;  %v1090_v52 = vld [vmem:[#allocation5 + $0x160] sm:$0xf]  ;;  %v983_v53 = vor.u32 %v1230_v43, %v980_v44 }
  0x21   :  { %631 = vmatpush.bf16.msrb.mxu2 %v1159_v39  ;;  %v1143_v49 = vor.u32 %v1270_v45, %v1140_v47  ;;  %v1260_v54 = vld [vmem:[#allocation5 + $0x16c] sm:$0xf0]  ;;  %v1266_v55 = vld [vmem:[#allocation5 + $0x1a4] sm:$0xf]  ;;  %v1124_v56 = vld [vmem:[#allocation5 + $0x1b0] sm:$0xf0]  ;;  %v963_v59 = vor.u32 %v1228_v51, %v962_v50 }
  0x22   :  { %614 = vmatpush.bf16.msra.mxu3 %v999_v38  ;;  %v1226_v57 = vld [vmem:[#allocation5 + $0x64] sm:$0xf]  ;;  %v964_v58 = vld [vmem:[#allocation5 + $0x70] sm:$0xf0]  ;;  %v1091_v60 = vor.u32 %v1260_v54, %v1090_v52  ;;  %v1127_v61 = vor.u32 %v1266_v55, %v1124_v56  ;;  %v946_v62 = vld [vmem:[#allocation5 + $0x40] sm:$0xf] }
  0x23   :  { %558 = vmatpush.bf16.msra.mxu0 %v979_v46  ;;  %v1224_v63 = vld [vmem:[#allocation5 + $0x4c] sm:$0xf0]  ;;  %v1074_v0 = vld [vmem:[#allocation5 + $0x140] sm:$0xf]  ;;  %v967_v1 = vor.u32 %v1226_v57, %v964_v58  ;;  %v1262_v3 = vld [vmem:[#allocation5 + $0x184] sm:$0xf] }
  0x24   :  { %577 = vmatpush.bf16.msra.mxu1 %v1107_v48  ;;  %v1256_v2 = vld [vmem:[#allocation5 + $0x14c] sm:$0xf0]  ;;  %v1108_v4 = vld [vmem:[#allocation5 + $0x190] sm:$0xf0]  ;;  %v1222_v5 = vld [vmem:[#allocation5 + $0x44] sm:$0xf]  ;;  %v947_v7 = vor.u32 %v1224_v63, %v946_v62 }
  0x25   :  { %632 = vmatpush.bf16.msrb.mxu2 %v1143_v49  ;;  %v948_v6 = vld [vmem:[#allocation5 + $0x50] sm:$0xf0]  ;;  %v910_v8 = vld [vmem:[#allocation2 + $0x20] sm:$0xf]  ;;  %v1213_v9 = vld [vmem:[#allocation2 + $0x28] sm:$0xf0]  ;;  %v1075_v10 = vor.u32 %v1256_v2, %v1074_v0  ;;  %v1111_v11 = vor.u32 %v1262_v3, %v1108_v4 }
  0x26   :  { %615 = vmatpush.bf16.msra.mxu3 %v983_v53  ;;  %v930_v12 = vld [vmem:[#allocation5 + $0x20] sm:$0xf]  ;;  %v1220_v13 = vld [vmem:[#allocation5 + $0x2c] sm:$0xf0]  ;;  %v951_v15 = vor.u32 %v1222_v5, %v948_v6  ;;  %v1258_v17 = vld [vmem:[#allocation5 + $0x164] sm:$0xf]  ;;  %v1485_v21 = vor.u32 %v1213_v9, %v910_v8 }
  0x27   :  { %559 = vmatpush.bf16.msra.mxu0 %v963_v59  ;;  %v1058_v14 = vld [vmem:[#allocation5 + $0x120] sm:$0xf]  ;;  %v1252_v16 = vld [vmem:[#allocation5 + $0x12c] sm:$0xf0]  ;;  %v1092_v18 = vld [vmem:[#allocation5 + $0x170] sm:$0xf0]  ;;  %v931_v22 = vor.u32 %v1220_v13, %v930_v12 }
  0x28   :  { %578 = vmatpush.bf16.msra.mxu1 %v1091_v60  ;;  %v1218_v19 = vld [vmem:[#allocation5 + $0x24] sm:$0xf]  ;;  %v932_v20 = vld [vmem:[#allocation5 + $0x30] sm:$0xf0]  ;;  %v914_v23 = vld [vmem:[#allocation5] sm:$0xf]  ;;  %v1059_v25 = vor.u32 %v1252_v16, %v1058_v14  ;;  %v1095_v26 = vor.u32 %v1258_v17, %v1092_v18 }
  0x29   :  { %633 = vmatpush.bf16.msrb.mxu2 %v1127_v61  ;;  %v1216_v24 = vld [vmem:[#allocation5 + $0xc] sm:$0xf0]  ;;  %v1042_v27 = vld [vmem:[#allocation5 + $0x100] sm:$0xf]  ;;  %v1214_v30 = vld [vmem:[#allocation5 + $0x4] sm:$0xf]  ;;  %v935_v31 = vor.u32 %v1218_v19, %v932_v20 }
  0x2a   :  { %616 = vmatpush.bf16.msra.mxu3 %v967_v1  ;;  %v1248_v28 = vld [vmem:[#allocation5 + $0x10c] sm:$0xf0]  ;;  %v916_v32 = vld [vmem:[#allocation5 + $0x10] sm:$0xf0]  ;;  %v1254_v33 = vld [vmem:[#allocation5 + $0x144] sm:$0xf]  ;;  %v915_v38 = vor.u32 %v1216_v24, %v914_v23 }
  0x2b   :  { %560 = vmatpush.bf16.msra.mxu0 %v947_v7  ;;  %v1076_v34 = vld [vmem:[#allocation5 + $0x150] sm:$0xf0]  ;;  %v890_v35 = vld [vmem:[#allocation2] sm:$0xf]  ;;  %v1034_v36 = vld [vmem:[#allocation5 + $0xe8] sm:$0xf]  ;;  %v1043_v42 = vor.u32 %v1248_v28, %v1042_v27  ;;  %v919_v46 = vor.u32 %v1214_v30, %v916_v32 }
  0x2c   :  { %579 = vmatpush.bf16.msra.mxu1 %v1075_v10  ;;  %v1245_v37 = vld [vmem:[#allocation5 + $0xf4] sm:$0xf0]  ;;  %v1209_v39 = vld [vmem:[#allocation2 + $0x8] sm:$0xf0]  ;;  %v1162_v40 = vld [vmem:[#allocation5 + $0x1e8] sm:$0xf]  ;;  %v1079_v43 = vor.u32 %v1254_v33, %v1076_v34 }
  0x2d   :  { %634 = vmatpush.bf16.msrb.mxu2 %v1111_v11  ;;  %v1277_v41 = vld [vmem:[#allocation5 + $0x1f4] sm:$0xf0]  ;;  %v1208_v44 = vld [vmem:[#allocation2 + $0x4] sm:$0xf]  ;;  %v892_v45 = vld [vmem:[#allocation2 + $0xc] sm:$0xf0]  ;;  %v1035_v49 = vor.u32 %v1245_v37, %v1034_v36  ;;  %v1489_v50 = vor.u32 %v1209_v39, %v890_v35 }
  0x2e   :  { %617 = vmatpush.bf16.msra.mxu3 %v951_v15  ;;  %v1250_v47 = vld [vmem:[#allocation5 + $0x124] sm:$0xf]  ;;  %v1060_v48 = vld [vmem:[#allocation5 + $0x130] sm:$0xf0]  ;;  %v1163_v51 = vor.u32 %v1277_v41, %v1162_v40  ;;  %v1018_v52 = vld [vmem:[#allocation5 + $0xc8] sm:$0xf]  ;;  %v1491_v54 = vor.u32 %v1208_v44, %v892_v45 }
  0x2f   :  { %561 = vmatpush.bf16.msra.mxu0 %v931_v22  ;;  %v1241_v53 = vld [vmem:[#allocation5 + $0xd4] sm:$0xf0]  ;;  %v1146_v55 = vld [vmem:[#allocation5 + $0x1c8] sm:$0xf]  ;;  %v1063_v57 = vor.u32 %v1250_v47, %v1060_v48  ;;  %v1246_v58 = vld [vmem:[#allocation5 + $0x104] sm:$0xf] }
  0x30   :  { %1201 = vmatmul.msk.bf16.gmra.mxu2 %vm548_vm0, %v1485_v21  ;;  %580 = vmatpush.bf16.msra.mxu1 %v1059_v25  ;;  %v1273_v56 = vld [vmem:[#allocation5 + $0x1d4] sm:$0xf0]  ;;  %v1044_v59 = vld [vmem:[#allocation5 + $0x110] sm:$0xf0]  ;;  %v1019_v60 = vor.u32 %v1241_v53, %v1018_v52  ;;  %v1002_v61 = vld [vmem:[#allocation5 + $0xa8] sm:$0xf] }
  0x31   :  { %635 = vmatpush.bf16.msrb.mxu2 %v1095_v26  ;;  %v1237_v62 = vld [vmem:[#allocation5 + $0xb4] sm:$0xf0]  ;;  %v1194_v63 = vld [vmem:[#allocation5 + $0x228] sm:$0xf]  ;;  %v1147_v0 = vor.u32 %v1273_v56, %v1146_v55  ;;  %v1282_v2 = vld [vmem:[#allocation5 + $0x224] sm:$0xf]  ;;  %v1047_v7 = vor.u32 %v1246_v58, %v1044_v59 }
  0x32   :  { %618 = vmatpush.bf16.msra.mxu3 %v935_v31  ;;  %v1285_v1 = vld [vmem:[#allocation5 + $0x234] sm:$0xf0]  ;;  %v1188_v3 = vld [vmem:[#allocation5 + $0x230] sm:$0xf0]  ;;  %v1130_v4 = vld [vmem:[#allocation5 + $0x1a8] sm:$0xf]  ;;  %v1003_v8 = vor.u32 %v1237_v62, %v1002_v61 }
  0x33   :  { %562 = vmatpush.bf16.msra.mxu0 %v915_v38  ;;  %v1269_v5 = vld [vmem:[#allocation5 + $0x1b4] sm:$0xf0]  ;;  %v1191_v6 = vor.u32 %v1282_v2, %v1188_v3  ;;  %v1114_v9 = vld [vmem:[#allocation5 + $0x188] sm:$0xf]  ;;  %v1195_v11 = vor.u32 %v1285_v1, %v1194_v63  ;;  %v1278_v14 = vld [vmem:[#allocation5 + $0x204] sm:$0xf] }
  0x34   :  { %581 = vmatpush.bf16.msra.mxu1 %v1043_v42  ;;  %v986_v10 = vld [vmem:[#allocation5 + $0x88] sm:$0xf]  ;;  %v1131_v12 = vor.u32 %v1269_v5, %v1130_v4  ;;  %v1233_v13 = vld [vmem:[#allocation5 + $0x94] sm:$0xf0]  ;;  %v1172_v15 = vld [vmem:[#allocation5 + $0x210] sm:$0xf0] }
  0x35   :  { %636 = vmatpush.bf16.msrb.mxu2 %v1079_v43  ;;  %v1265_v16 = vld [vmem:[#allocation5 + $0x194] sm:$0xf0]  ;;  %v1175_v17 = vor.u32 %v1278_v14, %v1172_v15  ;;  %v1178_v18 = vld [vmem:[#allocation5 + $0x208] sm:$0xf]  ;;  %v1243_v20 = vld [vmem:[#allocation5 + $0xec] sm:$0xf]  ;;  %v987_v22 = vor.u32 %v1233_v13, %v986_v10 }
  0x36   :  { %619 = vmatpush.bf16.msra.mxu3 %v919_v46  ;;  %563 = vmatmul.bf16.vlgmr.msra.gmra.mxu0 %v1489_v50  ;;  %v1281_v19 = vld [vmem:[#allocation5 + $0x214] sm:$0xf0]  ;;  %v902_v23 = vld [vmem:[#allocation2 + $0x18] sm:$0xf]  ;;  %v1036_v26 = vld [vmem:[#allocation5 + $0xf8] sm:$0xf0]  ;;  %v1115_v27 = vor.u32 %v1265_v16, %v1114_v9 }
  0x37   :  { %582 = vmatmul.bf16.vlgmr.msra.gmra.mxu1 %v1491_v54  ;;  %656 = vmatpush.bf16.msrb.mxu0 %v1191_v6  ;;  %v970_v24 = vld [vmem:[#allocation5 + $0x68] sm:$0xf]  ;;  %v1179_v25 = vor.u32 %v1281_v19, %v1178_v18  ;;  %v1229_v28 = vld [vmem:[#allocation5 + $0x74] sm:$0xf0]  ;;  %v1039_v30 = vor.u32 %v1243_v20, %v1036_v26  ;;  %v1239_v31 = vld [vmem:[#allocation5 + $0xcc] sm:$0xf] }
  0x38   :  { %669 = vmatpush.bf16.msrb.mxu1 %v1035_v49  ;;  %v1020_v32 = vld [vmem:[#allocation5 + $0xd8] sm:$0xf0]  ;;  %v1212_v33 = vld [vmem:[#allocation2 + $0x20] sm:$0xf0]  ;;  %v1098_v34 = vld [vmem:[#allocation5 + $0x168] sm:$0xf]  ;;  %v971_v39 = vor.u32 %v1229_v28, %v970_v24 }
  0x39   :  { %620 = vmatmul.bf16.vlgmr.msra.gmra.mxu3 %v1489_v50  ;;  %637 = vmatpush.bf16.msrb.mxu2 %v1063_v57  ;;  %v1261_v35 = vld [vmem:[#allocation5 + $0x174] sm:$0xf0]  ;;  %v1211_v36 = vld [vmem:[#allocation2 + $0x1c] sm:$0xf]  ;;  %v1023_v38 = vor.u32 %v1239_v31, %v1020_v32  ;;  %v1004_v41 = vld [vmem:[#allocation5 + $0xb8] sm:$0xf0]  ;;  %v1497_v42 = vor.u32 %v1212_v33, %v902_v23 }
  0x3a   :  { %688 = vmatpush.bf16.msrb.mxu3 %v1163_v51  ;;  %v904_v37 = vld [vmem:[#allocation2 + $0x24] sm:$0xf0]  ;;  %v1235_v40 = vld [vmem:[#allocation5 + $0xac] sm:$0xf]  ;;  %v1099_v43 = vor.u32 %v1261_v35, %v1098_v34  ;;  %v954_v44 = vld [vmem:[#allocation5 + $0x48] sm:$0xf] }
  0x3b   :  { %657 = vmatpush.bf16.msrb.mxu0 %v1175_v17  ;;  %v1225_v45 = vld [vmem:[#allocation5 + $0x54] sm:$0xf0]  ;;  %v1499_v46 = vor.u32 %v1211_v36, %v904_v37  ;;  %v1082_v47 = vld [vmem:[#allocation5 + $0x148] sm:$0xf]  ;;  %v1007_v49 = vor.u32 %v1235_v40, %v1004_v41  ;;  %v1231_v52 = vld [vmem:[#allocation5 + $0x8c] sm:$0xf] }
  0x3c   :  { %670 = vmatpush.bf16.msrb.mxu1 %v1019_v60  ;;  %v1257_v48 = vld [vmem:[#allocation5 + $0x154] sm:$0xf0]  ;;  %v955_v51 = vor.u32 %v1225_v45, %v954_v44  ;;  %v988_v53 = vld [vmem:[#allocation5 + $0x98] sm:$0xf0]  ;;  %v938_v56 = vld [vmem:[#allocation5 + $0x28] sm:$0xf] }
  0x3d   :  { %638 = vmatpush.bf16.msrb.mxu2 %v1047_v7  ;;  %v1083_v55 = vor.u32 %v1257_v48, %v1082_v47  ;;  %v1221_v57 = vld [vmem:[#allocation5 + $0x34] sm:$0xf0]  ;;  %v1066_v58 = vld [vmem:[#allocation5 + $0x128] sm:$0xf]  ;;  %v991_v60 = vor.u32 %v1231_v52, %v988_v53  ;;  %v1227_v62 = vld [vmem:[#allocation5 + $0x6c] sm:$0xf] }
  0x3e   :  { %689 = vmatpush.bf16.msrb.mxu3 %v1147_v0  ;;  %v1253_v59 = vld [vmem:[#allocation5 + $0x134] sm:$0xf0]  ;;  %v939_v61 = vor.u32 %v1221_v57, %v938_v56  ;;  %v972_v63 = vld [vmem:[#allocation5 + $0x78] sm:$0xf0]  ;;  %v1050_v1 = vld [vmem:[#allocation5 + $0x108] sm:$0xf] }
  0x3f   :  { %726 = vmatpush.bf16.msra.mxu0 %v1039_v30  ;;  %v1067_v0 = vor.u32 %v1253_v59, %v1066_v58  ;;  %v922_v2 = vld [vmem:[#allocation5 + $0x8] sm:$0xf]  ;;  %v1217_v3 = vld [vmem:[#allocation5 + $0x14] sm:$0xf0]  ;;  %v1275_v5 = vld [vmem:[#allocation5 + $0x1ec] sm:$0xf]  ;;  %v975_v9 = vor.u32 %v1227_v62, %v972_v63 }
  0x40   :  { %671 = vmatpush.bf16.msrb.mxu1 %v1003_v8  ;;  %639 = vmatmul.bf16.vlgmr.msrb.gmra.mxu2 %v1491_v54  ;;  %v1249_v4 = vld [vmem:[#allocation5 + $0x114] sm:$0xf0]  ;;  %v1164_v6 = vld [vmem:[#allocation5 + $0x1f8] sm:$0xf0]  ;;  %v1283_v7 = vld [vmem:[#allocation5 + $0x22c] sm:$0xf]  ;;  %v923_v10 = vor.u32 %v1217_v3, %v922_v2 }
  0x41   :  { %713 = vmatpush.bf16.msra.mxu2 %v1195_v11  ;;  %v1196_v8 = vld [vmem:[#allocation5 + $0x238] sm:$0xf0]  ;;  %v1223_v11 = vld [vmem:[#allocation5 + $0x4c] sm:$0xf]  ;;  %v1051_v13 = vor.u32 %v1249_v4, %v1050_v1  ;;  %v1167_v14 = vor.u32 %v1275_v5, %v1164_v6  ;;  %v1525_v56 = vld [vmem:[#allocation7] sm:$0xf] }
  0x42   :  { %690 = vmatpush.bf16.msrb.mxu3 %v1131_v12  ;;  %v956_v12 = vld [vmem:[#allocation5 + $0x58] sm:$0xf0]  ;;  %v1199_v15 = vor.u32 %v1283_v7, %v1196_v8  ;;  %v1271_v16 = vld [vmem:[#allocation5 + $0x1cc] sm:$0xf]  ;;  %v785_v59 = vperm.slane %v1525_v56, 0  ;;  %s871_s3 = sshll.u32 %s1441_s2, 4  ;;  %s872_s3 = int_to_ptr.vmem [resolvable:$true] %s871_s3 }
  0x43   :  { %727 = vmatpush.bf16.msra.mxu0 %v1023_v38  ;;  %v1148_v17 = vld [vmem:[#allocation5 + $0x1d8] sm:$0xf0]  ;;  %v1279_v18 = vld [vmem:[#allocation5 + $0x20c] sm:$0xf]  ;;  %v959_v20 = vor.u32 %v1223_v11, %v956_v12  ;;  %s873_s13 = sshll.u32 %s1544_s4, 4  ;;  %s1442_s14 = smov 512   ;;  %s874_s13 = int_to_ptr.hbm [resolvable:$true] %s873_s13 }
  0x44   :  { %672 = vmatpush.bf16.msrb.mxu1 %v987_v22  ;;  %v1180_v19 = vld [vmem:[#allocation5 + $0x218] sm:$0xf0]  ;;  %v1219_v22 = vld [vmem:[#allocation5 + $0x2c] sm:$0xf]  ;;  %v1151_v24 = vor.u32 %v1271_v16, %v1148_v17  ;;  %s1443_s15 = smov 32  }
  0x45   :  { %714 = vmatpush.bf16.msra.mxu2 %v1179_v25  ;;  %v940_v23 = vld [vmem:[#allocation5 + $0x38] sm:$0xf0]  ;;  %v1267_v25 = vld [vmem:[#allocation5 + $0x1ac] sm:$0xf] }
  0x46   :  { %691 = vmatpush.bf16.msrb.mxu3 %v1115_v27  ;;  %568 = vmatmul.bf16.gmra.mxu0 %v1497_v42  ;;  %v1132_v26 = vld [vmem:[#allocation5 + $0x1b8] sm:$0xf0]  ;;  %v1183_v27 = vor.u32 %v1279_v18, %v1180_v19  ;;  %v943_v28 = vor.u32 %v1219_v22, %v940_v23  ;;  %v1263_v33 = vld [vmem:[#allocation5 + $0x18c] sm:$0xf] }
  0x47   :  { %587 = vmatmul.bf16.gmra.mxu1 %v1499_v46  ;;  %728 = vmatpush.bf16.msra.mxu0 %v1007_v49  ;;  %v924_v31 = vld [vmem:[#allocation5 + $0x18] sm:$0xf0]  ;;  %v1135_v32 = vor.u32 %v1267_v25, %v1132_v26  ;;  %v1259_v37 = vld [vmem:[#allocation5 + $0x16c] sm:$0xf]  ;;  %v786_v25 = vperm.slane %v1525_v56, 1 }
  0x48   :  { %673 = vmatpush.bf16.msrb.mxu1 %v971_v39  ;;  %v1116_v34 = vld [vmem:[#allocation5 + $0x198] sm:$0xf0]  ;;  %v1255_v40 = vld [vmem:[#allocation5 + $0x14c] sm:$0xf] }
  0x49   :  { %1286 = vmatpush.bf16.msrb.mxu2 %v1039_v30  ;;  %625 = vmatmul.bf16.gmra.mxu3 %v1497_v42  ;;  %v1215_v30 = vld [vmem:[#allocation5 + $0xc] sm:$0xf]  ;;  %v1119_v36 = vor.u32 %v1263_v33, %v1116_v34  ;;  %v1084_v41 = vld [vmem:[#allocation5 + $0x158] sm:$0xf0] }
  0x4a   :  { %692 = vmatpush.bf16.msrb.mxu3 %v1099_v43  ;;  %v927_v35 = vor.u32 %v1215_v30, %v924_v31  ;;  %v1087_v43 = vor.u32 %v1255_v40, %v1084_v41  ;;  %v1251_v44 = vld [vmem:[#allocation5 + $0x12c] sm:$0xf]  ;;  %v1068_v45 = vld [vmem:[#allocation5 + $0x138] sm:$0xf0] }
  0x4b   :  { %729 = vmatpush.bf16.msra.mxu0 %v991_v60  ;;  %v1071_v47 = vor.u32 %v1251_v44, %v1068_v45  ;;  %v1247_v48 = vld [vmem:[#allocation5 + $0x10c] sm:$0xf] }
  0x4c   :  { %674 = vmatpush.bf16.msrb.mxu1 %v955_v51 }
  0x4d   :  { %1287 = vmatpush.bf16.msrb.mxu2 %v1023_v38  ;;  %v1100_v38 = vld [vmem:[#allocation5 + $0x178] sm:$0xf0] }
  0x4e   :  { %693 = vmatpush.bf16.msrb.mxu3 %v1083_v55  ;;  %v1103_v39 = vor.u32 %v1259_v37, %v1100_v38 }
  0x4f   :  { %730 = vmatpush.bf16.msra.mxu0 %v975_v9 }
  0x50   :  { %675 = vmatpush.bf16.msrb.mxu1 %v939_v61  ;;  %644 = vmatmul.bf16.gmra.mxu2 %v1499_v46 }
  0x51   :  { %1288 = vmatpush.bf16.msrb.mxu2 %v1007_v49  ;;  %v1052_v49 = vld [vmem:[#allocation5 + $0x118] sm:$0xf0] }
  0x52   :  { %694 = vmatpush.bf16.msrb.mxu3 %v1067_v0  ;;  %v1055_v51 = vor.u32 %v1247_v48, %v1052_v49  ;;  %v787_v48 = vperm.slane %v1525_v56, 2 }
  0x53   :  { %731 = vmatpush.bf16.msra.mxu0 %v959_v20 }
  0x54   :  { %676 = vmatpush.bf16.msrb.mxu1 %v923_v10 }
  0x55   :  { %1289 = vmatpush.bf16.msrb.mxu2 %v991_v60 }
  0x56   :  { %695 = vmatpush.bf16.msrb.mxu3 %v1051_v13  ;;  %1202 = vmatmul.msk.bf16.vlgmr.msrb.gmra.mxu0 %vm548_vm0, %v1481_v29 }
  0x57   :  { %677 = vmatmul.bf16.vlgmr.msrb.gmra.mxu1 %v1489_v50  ;;  %732 = vmatpush.bf16.msra.mxu0 %v943_v28 }
  0x58   :  { %745 = vmatpush.bf16.msra.mxu1 %v1167_v14 }
  0x59   :  { %1290 = vmatpush.bf16.msrb.mxu2 %v975_v9  ;;  %696 = vmatmul.bf16.vlgmr.msrb.gmra.mxu3 %v1491_v54 }
  0x5a   :  { %770 = vmatpush.bf16.msra.mxu3 %v1199_v15 }
  0x5b   :  { %733 = vmatpush.bf16.msra.mxu0 %v927_v35 }
  0x5c   :  { %746 = vmatpush.bf16.msra.mxu1 %v1151_v24 }
  0x5d   :  { %1291 = vmatpush.bf16.msrb.mxu2 %v959_v20 }
  0x5e   :  { %771 = vmatpush.bf16.msra.mxu3 %v1183_v27 }
  0x60   :  { %747 = vmatpush.bf16.msra.mxu1 %v1135_v32  ;;  %1204 = vmatmul.msk.bf16.vlgmr.msra.gmra.mxu2 %vm548_vm0, %v1481_v29 }
  0x61   :  { %1292 = vmatpush.bf16.msrb.mxu2 %v943_v28 }
  0x64   :  { %748 = vmatpush.bf16.msra.mxu1 %v1119_v36 }
  0x65   :  { %1293 = vmatpush.bf16.msrb.mxu2 %v927_v35 }
  0x66   :  { %1203 = vmatmul.msk.bf16.gmra.mxu0 %vm548_vm0, %v1485_v21 }
  0x67   :  { %682 = vmatmul.bf16.gmra.mxu1 %v1497_v42 }
  0x68   :  { %749 = vmatpush.bf16.msra.mxu1 %v1103_v39 }
  0x69   :  { %701 = vmatmul.bf16.gmra.mxu3 %v1499_v46 }
  0x6c   :  { %750 = vmatpush.bf16.msra.mxu1 %v1087_v43 }
  0x70   :  { %751 = vmatpush.bf16.msra.mxu1 %v1071_v47  ;;  %1205 = vmatmul.msk.bf16.gmra.mxu2 %vm548_vm0, %v1485_v21 }
  0x74   :  { %752 = vmatpush.bf16.msra.mxu1 %v1055_v51 }
  0x76   :  { %734 = vmatmul.bf16.vlgmr.msra.gmra.mxu0 %v1489_v50  ;;  %v1527_v50 = vld [vmem:[#allocation8] sm:$0xf] }
  0x77   :  { %753 = vmatmul.bf16.vlgmr.msra.gmra.mxu1 %v1491_v54  ;;  %v812_v31 = vperm.slane %v1527_v50, 1 }
  0x79   :  { %1206 = vmatmul.msk.bf16.vlgmr.msra.gmra.mxu3 %vm548_vm0, %v1481_v29 }
  0x80   :  { %739 = vmatmul.bf16.vlgmr.msrb.gmra.mxu2 %v1497_v42  ;;  %v811_v42 = vperm.slane %v1527_v50, 0 }
  0x87   :  { %758 = vmatmul.bf16.gmra.mxu1 %v1499_v46 }
  0x89   :  { %1207 = vmatmul.msk.bf16.gmra.mxu3 %vm548_vm0, %v1485_v21 }
  0xa3   :  { %v602_v52 = vpop.f32.mrf.mxu2 }
  0xab   :  { %v604_v53 = vpop.f32.mrf.mxu2 }
  0xb3   :  { %v607_v55 = vpop.f32.mrf.mxu2  ;;  %v564_v57 = vpop.f32.mrf.mxu0 }
  0xb4   :  { %v583_v58 = vpop.f32.mrf.mxu1 }
  0xb5   :  { %v584_v54 = vadd.f32 %v583_v58, %v564_v57  ;;  %v813_v57 = vperm.slane %v1527_v50, 2 }
  0xb7   :  { %v603_v29 = vadd.f32 %v602_v52, %v584_v54 }
  0xb9   :  { %v793_v60 = vmul.f32 %v785_v59, %v603_v29 }
  0xbb   :  { %v609_v46 = vpop.f32.mrf.mxu2  ;;  %v819_v61 = vadd.f32 %v811_v42, %v793_v60  ;;  %v566_v21 = vpop.f32.mrf.mxu0 }
  0xbc   :  { %v621_v62 = vpop.f32.mrf.mxu3  ;;  %v585_v63 = vpop.f32.mrf.mxu1 }
  0xbd   :  { %v835_v0 = vmax.f32 %v819_v61, 0.0  ;;  %v586_v1 = vadd.f32 %v585_v63, %v566_v21 }
  0xbf   :  { %851 = vst [vmem:[#allocation10] sm:$0xff] %v835_v0  ;;  %v605_v2 = vadd.f32 %v604_v53, %v586_v1 }
  0xc1   :  { %v797_v3 = vmul.f32 %v785_v59, %v605_v2 }
  0xc3   :  { %v640_v4 = vpop.f32.mrf.mxu2  ;;  %v823_v5 = vadd.f32 %v811_v42, %v797_v3  ;;  %v569_v7 = vpop.f32.mrf.mxu0 }
  0xc4   :  { %v623_v6 = vpop.f32.mrf.mxu3  ;;  %v588_v8 = vpop.f32.mrf.mxu1  ;;  %v641_v23 = vadd.f32 %v640_v4, %v621_v62 }
  0xc5   :  { %v839_v9 = vmax.f32 %v823_v5, 0.0  ;;  %v589_v10 = vadd.f32 %v588_v8, %v569_v7 }
  0xc7   :  { %855 = vst [vmem:[#allocation10 + $0x20] sm:$0xff] %v839_v9  ;;  %v608_v11 = vadd.f32 %v607_v55, %v589_v10 }
  0xc9   :  { %v801_v12 = vmul.f32 %v785_v59, %v608_v11 }
  0xcb   :  { %v642_v13 = vpop.f32.mrf.mxu2  ;;  %v827_v14 = vadd.f32 %v811_v42, %v801_v12  ;;  %v571_v16 = vpop.f32.mrf.mxu0 }
  0xcc   :  { %v626_v15 = vpop.f32.mrf.mxu3  ;;  %v590_v17 = vpop.f32.mrf.mxu1  ;;  %v643_v36 = vadd.f32 %v642_v13, %v623_v6 }
  0xcd   :  { %v843_v18 = vmax.f32 %v827_v14, 0.0  ;;  %v591_v19 = vadd.f32 %v590_v17, %v571_v16 }
  0xcf   :  { %859 = vst [vmem:[#allocation10 + $0x40] sm:$0xff] %v843_v18  ;;  %v610_v20 = vadd.f32 %v609_v46, %v591_v19 }
  0xd1   :  { %v805_v22 = vmul.f32 %v785_v59, %v610_v20 }
  0xd3   :  { %v645_v24 = vpop.f32.mrf.mxu2  ;;  %v831_v26 = vadd.f32 %v811_v42, %v805_v22  ;;  %v659_v28 = vpop.f32.mrf.mxu0 }
  0xd4   :  { %v628_v27 = vpop.f32.mrf.mxu3  ;;  %v660_v30 = vadd.f32 %v659_v28, %v641_v23  ;;  %v678_v32 = vpop.f32.mrf.mxu1  ;;  %v646_v49 = vadd.f32 %v645_v24, %v626_v15 }
  0xd5   :  { %v847_v33 = vmax.f32 %v831_v26, 0.0 }
  0xd6   :  { %v794_v34 = vmul.f32 %v786_v25, %v660_v30  ;;  %v814_v30 = vperm.slane %v1527_v50, 3 }
  0xd7   :  { %863 = vst [vmem:[#allocation10 + $0x60] sm:$0xff] %v847_v33 }
  0xd8   :  { %v820_v35 = vadd.f32 %v812_v31, %v794_v34 }
  0xda   :  { %v836_v37 = vmax.f32 %v820_v35, 0.0 }
  0xdb   :  { %v647_v38 = vpop.f32.mrf.mxu2  ;;  %v661_v40 = vpop.f32.mrf.mxu0 }
  0xdc   :  { %v697_v39 = vpop.f32.mrf.mxu3  ;;  %852 = vst [vmem:[#allocation10 + $0x8] sm:$0xff] %v836_v37  ;;  %v662_v41 = vadd.f32 %v661_v40, %v643_v36  ;;  %v680_v43 = vpop.f32.mrf.mxu1  ;;  %v648_v21 = vadd.f32 %v647_v38, %v628_v27 }
  0xdd   :  { %v698_v47 = vadd.f32 %v697_v39, %v678_v32 }
  0xde   :  { %v798_v44 = vmul.f32 %v786_v25, %v662_v41 }
  0xe0   :  { %v824_v45 = vadd.f32 %v812_v31, %v798_v44 }
  0xe2   :  { %v840_v51 = vmax.f32 %v824_v45, 0.0 }
  0xe3   :  { %v716_v52 = vpop.f32.mrf.mxu2  ;;  %v664_v58 = vpop.f32.mrf.mxu0 }
  0xe4   :  { %v699_v53 = vpop.f32.mrf.mxu3  ;;  %v717_v55 = vadd.f32 %v716_v52, %v698_v47  ;;  %856 = vst [vmem:[#allocation10 + $0x28] sm:$0xff] %v840_v51  ;;  %v665_v54 = vadd.f32 %v664_v58, %v646_v49  ;;  %v683_v59 = vpop.f32.mrf.mxu1 }
  0xe5   :  { %v700_v61 = vadd.f32 %v699_v53, %v680_v43 }
  0xe6   :  { %v795_v29 = vmul.f32 %v787_v48, %v717_v55  ;;  %v802_v42 = vmul.f32 %v786_v25, %v665_v54 }
  0xe8   :  { %v821_v60 = vadd.f32 %v813_v57, %v795_v29  ;;  %v828_v46 = vadd.f32 %v812_v31, %v802_v42 }
  0xea   :  { %v837_v62 = vmax.f32 %v821_v60, 0.0  ;;  %v844_v63 = vmax.f32 %v828_v46, 0.0 }
  0xeb   :  { %v718_v0 = vpop.f32.mrf.mxu2  ;;  %v666_v3 = vpop.f32.mrf.mxu0 }
  0xec   :  { %853 = vst [vmem:[#allocation10 + $0x10] sm:$0xff] %v837_v62  ;;  %v702_v1 = vpop.f32.mrf.mxu3  ;;  %v719_v2 = vadd.f32 %v718_v0, %v700_v61  ;;  %v667_v4 = vadd.f32 %v666_v3, %v648_v21  ;;  %v685_v5 = vpop.f32.mrf.mxu1 }
  0xed   :  { %860 = vst [vmem:[#allocation10 + $0x48] sm:$0xff] %v844_v63  ;;  %v703_v10 = vadd.f32 %v702_v1, %v683_v59 }
  0xee   :  { %v799_v6 = vmul.f32 %v787_v48, %v719_v2  ;;  %v806_v7 = vmul.f32 %v786_v25, %v667_v4  ;;  %v788_v25 = vperm.slane %v1525_v56, 3 }
  0xf0   :  { %v825_v8 = vadd.f32 %v813_v57, %v799_v6  ;;  %v832_v9 = vadd.f32 %v812_v31, %v806_v7 }
  0xf2   :  { %v841_v11 = vmax.f32 %v825_v8, 0.0  ;;  %v848_v12 = vmax.f32 %v832_v9, 0.0 }
  0xf3   :  { %v721_v13 = vpop.f32.mrf.mxu2  ;;  %v735_v18 = vpop.f32.mrf.mxu0 }
  0xf4   :  { %857 = vst [vmem:[#allocation10 + $0x30] sm:$0xff] %v841_v11  ;;  %v704_v14 = vpop.f32.mrf.mxu3  ;;  %v722_v15 = vadd.f32 %v721_v13, %v703_v10  ;;  %v754_v16 = vpop.f32.mrf.mxu1 }
  0xf5   :  { %864 = vst [vmem:[#allocation10 + $0x68] sm:$0xff] %v848_v12  ;;  %v755_v20 = vadd.f32 %v754_v16, %v735_v18  ;;  %v705_v22 = vadd.f32 %v704_v14, %v685_v5 }
  0xf6   :  { %v803_v17 = vmul.f32 %v787_v48, %v722_v15 }
  0xf8   :  { %v829_v19 = vadd.f32 %v813_v57, %v803_v17 }
  0xfa   :  { %v845_v23 = vmax.f32 %v829_v19, 0.0 }
  0xfb   :  { %v723_v24 = vpop.f32.mrf.mxu2  ;;  %v737_v35 = vpop.f32.mrf.mxu0 }
  0xfc   :  { %861 = vst [vmem:[#allocation10 + $0x50] sm:$0xff] %v845_v23  ;;  %v724_v26 = vadd.f32 %v723_v24, %v705_v22  ;;  %v773_v27 = vpop.f32.mrf.mxu3  ;;  %v756_v31 = vpop.f32.mrf.mxu1 }
  0xfd   :  { %v774_v28 = vadd.f32 %v773_v27, %v755_v20  ;;  %v757_v39 = vadd.f32 %v756_v31, %v737_v35 }
  0xfe   :  { %v807_v32 = vmul.f32 %v787_v48, %v724_v26 }
  0xff   :  { %v796_v33 = vmul.f32 %v788_v25, %v774_v28 }
 0x100   :  { %v833_v34 = vadd.f32 %v813_v57, %v807_v32 }
 0x101   :  { %v822_v36 = vadd.f32 %v814_v30, %v796_v33 }
 0x102   :  { %v849_v37 = vmax.f32 %v833_v34, 0.0 }
 0x103   :  { %v838_v38 = vmax.f32 %v822_v36, 0.0  ;;  %v740_v44 = vpop.f32.mrf.mxu2 }
 0x104   :  { %865 = vst [vmem:[#allocation10 + $0x70] sm:$0xff] %v849_v37  ;;  %v775_v40 = vpop.f32.mrf.mxu3  ;;  %v759_v56 = vpop.f32.mrf.mxu1 }
 0x105   :  { %854 = vst [vmem:[#allocation10 + $0x18] sm:$0xff] %v838_v38  ;;  %v776_v41 = vadd.f32 %v775_v40, %v757_v39  ;;  %v760_v47 = vadd.f32 %v759_v56, %v740_v44 }
 0x107   :  { %v800_v43 = vmul.f32 %v788_v25, %v776_v41 }
 0x109   :  { %v826_v45 = vadd.f32 %v814_v30, %v800_v43 }
 0x10b   :  { %v842_v49 = vmax.f32 %v826_v45, 0.0  ;;  %v742_v55 = vpop.f32.mrf.mxu2 }
 0x10c   :  { %v778_v50 = vpop.f32.mrf.mxu3  ;;  %v761_v52 = vpop.f32.mrf.mxu1 }
 0x10d   :  { %858 = vst [vmem:[#allocation10 + $0x38] sm:$0xff] %v842_v49  ;;  %v779_v48 = vadd.f32 %v778_v50, %v760_v47  ;;  %v762_v58 = vadd.f32 %v761_v52, %v742_v55 }
 0x10f   :  { %v804_v51 = vmul.f32 %v788_v25, %v779_v48 }
 0x111   :  { %v830_v53 = vadd.f32 %v814_v30, %v804_v51 }
 0x113   :  { %v846_v57 = vmax.f32 %v830_v53, 0.0 }
 0x114   :  { %v780_v54 = vpop.f32.mrf.mxu3 }
 0x115   :  { %862 = vst [vmem:[#allocation10 + $0x58] sm:$0xff] %v846_v57  ;;  %v781_v59 = vadd.f32 %v780_v54, %v762_v58 }
 0x117   :  { %v808_v29 = vmul.f32 %v788_v25, %v781_v59 }
 0x119   :  { %v834_v42 = vadd.f32 %v814_v30, %v808_v29 }
 0x11b   :  { %v850_v60 = vmax.f32 %v834_v42, 0.0 }
 0x11d   :  { %866 = vst [vmem:[#allocation10 + $0x78] sm:$0xff] %v850_v60 }
 0x11e   :  { %879 = dma.vmem_to_hbm [thread:$0]  %s872_s3, 2048, %s874_s13, [#allocation4], %s1442_s14, %s1442_s14, %s1443_s15  }
 0x11f   :  { %1431 = dma.done.wait [#allocation4], 2048  }
 0x120   :  { %1432 = vsyncadd [#allocation4], 4294965248 }
 0x121   :  { %884 = vsyncpa [#allocation3], 1 }
 0x122   :  { %885 = vsyncpa [#allocation6], 1 }
 0x123   :  { %886 = vsyncpa [#allocation9], 1 }
 0x124   :  { %887 = vsyncpa [#allocation4], 1 }

</bundles_post_ra>
